<compile_context>
chip_gen: v6e
topology: v6e:2x2x1
jax: 0.10.0
libtpu: 0.0.40
codegen_flags: <defaults>
</compile_context>

<pallas_src>
import functools

import jax
import jax.numpy as jnp
from jax.experimental import pallas as pl
from jax.experimental.pallas import tpu as pltpu

HIDDEN1 = 128
HIDDEN2 = 128
HIDDEN3 = 64

# Large batch tile: per-grid-step overhead (~0.35 us) dominates this workload,
# so fewer/bigger steps win.  Sweep 1024-4096 per generation if desired; 2048
# keeps double-buffered streams + intermediates far below the 32 MiB scoped
# VMEM limit (safe for v7x's 64 MiB physical VMEM shared by 2 TCs).
DEFAULT_TILE_B = 2048

# Minimum rows per tile for which splitting the batch across the two v7x
# TensorCores is worthwhile; below this a single grid step is cheaper.
_MIN_ROWS_PER_CORE = 512


def _round_up(n, m):
    return ((n + m - 1) // m) * m


def _mlp_kernel(x_ref,
                w1_ref, b1_ref,
                w2_ref, b2_ref,
                w3_ref, b3_ref,
                w4_ref, b4_ref,
                o_ref):
    """One batch-tile of the fused 4-layer MLP.

    Matmuls run on the MXU with bf16 inputs / f32 accumulation; bias-add and
    ReLU run on the VPU in f32.  The final store is lane-narrow
    (tile_b, num_outputs) -- a handful of masked vst per step, negligible.
    """
    x = x_ref[...].astype(jnp.bfloat16)

    # layer1 + ReLU
    h = jnp.dot(x, w1_ref[...], preferred_element_type=jnp.float32) + b1_ref[...]
    h = jnp.maximum(h, 0.0)

    # layer2 + ReLU
    h = jnp.dot(h.astype(jnp.bfloat16), w2_ref[...],
                preferred_element_type=jnp.float32) + b2_ref[...]
    h = jnp.maximum(h, 0.0)

    # layer3 + ReLU
    h = jnp.dot(h.astype(jnp.bfloat16), w3_ref[...],
                preferred_element_type=jnp.float32) + b3_ref[...]
    h = jnp.maximum(h, 0.0)

    # output layer (no activation)
    y = jnp.dot(h.astype(jnp.bfloat16), w4_ref[...],
                preferred_element_type=jnp.float32) + b4_ref[...]

    o_ref[...] = y.astype(o_ref.dtype)


def _prepare_kernel_params(params):
    """bf16 weights (MXU full rate, halves the one-time weight DMA); f32 biases."""
    return (
        params["w1"].astype(jnp.bfloat16), params["b1"].astype(jnp.float32),
        params["w2"].astype(jnp.bfloat16), params["b2"].astype(jnp.float32),
        params["w3"].astype(jnp.bfloat16), params["b3"].astype(jnp.float32),
        params["w4"].astype(jnp.bfloat16), params["b4"].astype(jnp.float32),
    )


def _choose_tile_b(batch, tile_b):
    """Pick the batch tile.

    * Large batches: use the big default tile (overhead-amortizing).
    * Mid-size batches that fit in one default tile: split into two parallel
      tiles so both v7x TensorCores get work (harmless on 1-TC v5e/v6e).
    * Tiny batches: single tile rounded up to the 8-sublane granule only.
    """
    rounded = _round_up(batch, 8)
    if rounded <= tile_b:
        if rounded >= 2 * _MIN_ROWS_PER_CORE:
            return _round_up((rounded + 1) // 2, 8)
        return rounded
    return tile_b


@functools.partial(jax.jit, static_argnames=("tile_b",))
def microneedle_quality_forward(x, params, tile_b=DEFAULT_TILE_B):
    """Fused MLP forward via a single batch-gridded pallas_call.

    x:      (batch, num_inputs) float32
    params: dict with w1,b1,w2,b2,w3,b3,w4,b4
            wk: (in_features, out_features) f32, bk: (1, out_features) f32
    returns (batch, num_outputs) float32
    """
    batch, num_inputs = x.shape
    num_outputs = params["w4"].shape[1]

    w1, b1, w2, b2, w3, b3, w4, b4 = _prepare_kernel_params(params)

    tile_b = _choose_tile_b(batch, tile_b)
    padded_batch = _round_up(batch, tile_b)
    if padded_batch != batch:
        # Padded rows pick up bias values through the layers; they are removed
        # by the row slice on the way out.
        x = jnp.pad(x, ((0, padded_batch - batch), (0, 0)))

    grid = (padded_batch // tile_b,)

    def _batch_map(i):
        return (i, 0)

    def _resident_map(i):
        return (0, 0)

    in_specs = [
        pl.BlockSpec((tile_b, num_inputs), _batch_map),   # x (streamed)
        pl.BlockSpec(w1.shape, _resident_map),            # weights/biases stay
        pl.BlockSpec(b1.shape, _resident_map),            # VMEM-resident
        pl.BlockSpec(w2.shape, _resident_map),
        pl.BlockSpec(b2.shape, _resident_map),
        pl.BlockSpec(w3.shape, _resident_map),
        pl.BlockSpec(b3.shape, _resident_map),
        pl.BlockSpec(w4.shape, _resident_map),
        pl.BlockSpec(b4.shape, _resident_map),
    ]
    # Lane-narrow output block: last dim equals the full array dim, so this is
    # legal and avoids both the 128-wide padded writeback and the wrapper
    # column slice (which re-read the whole padded slab).
    out_spec = pl.BlockSpec((tile_b, num_outputs), _batch_map)

    flops = 2 * padded_batch * (num_inputs * HIDDEN1
                                + HIDDEN1 * HIDDEN2
                                + HIDDEN2 * HIDDEN3
                                + HIDDEN3 * num_outputs)
    weight_bytes = sum(int(a.size) * a.dtype.itemsize
                       for a in (w1, b1, w2, b2, w3, b3, w4, b4))
    bytes_accessed = (int(x.size) * x.dtype.itemsize
                      + weight_bytes
                      + padded_batch * num_outputs * 4)
    cost = pl.CostEstimate(flops=flops, transcendentals=0,
                           bytes_accessed=bytes_accessed)

    out = pl.pallas_call(
        _mlp_kernel,
        out_shape=jax.ShapeDtypeStruct((padded_batch, num_outputs), jnp.float32),
        grid=grid,
        in_specs=in_specs,
        out_specs=out_spec,
        compiler_params=pltpu.CompilerParams(
            dimension_semantics=("parallel",),   # shards batch across TCs (v7x)
            vmem_limit_bytes=32 * 1024 * 1024,   # > v5e's 16 MiB default, safe on v7x
        ),
        cost_estimate=cost,
    )(x, w1, b1, w2, b2, w3, b3, w4, b4)

    if padded_batch != batch:
        out = out[:batch]
    return out


def init_params(key, num_inputs, num_outputs):
    """Deterministic init mimicking PyTorch nn.Linear defaults:
    U(-1/sqrt(fan_in), +1/sqrt(fan_in)) for both weight and bias."""
    dims = [(num_inputs, HIDDEN1), (HIDDEN1, HIDDEN2),
            (HIDDEN2, HIDDEN3), (HIDDEN3, num_outputs)]
    params = {}
    for i, (fan_in, fan_out) in enumerate(dims, start=1):
        key, kw, kb = jax.random.split(key, 3)
        bound = 1.0 / jnp.sqrt(float(fan_in))
        params[f"w{i}"] = jax.random.uniform(
            kw, (fan_in, fan_out), jnp.float32, minval=-bound, maxval=bound)
        params[f"b{i}"] = jax.random.uniform(
            kb, (1, fan_out), jnp.float32, minval=-bound, maxval=bound)
    return params


def reference_forward_f32(x, params):
    """Pure-JAX f32 reference (matches the PyTorch module exactly)."""
    h = jnp.maximum(x @ params["w1"] + params["b1"], 0.0)
    h = jnp.maximum(h @ params["w2"] + params["b2"], 0.0)
    h = jnp.maximum(h @ params["w3"] + params["b3"], 0.0)
    return h @ params["w4"] + params["b4"]


def reference_forward_bf16(x, params):
    """Pure-JAX reference emulating the kernel's bf16-matmul / f32-accumulate."""
    bf = jnp.bfloat16

    def lin(h, w, b):
        return jnp.dot(h.astype(bf), w.astype(bf),
                       preferred_element_type=jnp.float32) + b

    h = jnp.maximum(lin(x, params["w1"], params["b1"]), 0.0)
    h = jnp.maximum(lin(h, params["w2"], params["b2"]), 0.0)
    h = jnp.maximum(lin(h, params["w3"], params["b3"]), 0.0)
    return lin(h, params["w4"], params["b4"])


if __name__ == "__main__":
    num_inputs = 8     # printing parameters
    num_outputs = 4    # quality score components

    key = jax.random.PRNGKey(0)
    key, kp = jax.random.split(key)
    params = init_params(kp, num_inputs, num_outputs)

    # Case 1: tiny batch -> single-tile fast path (grid=(1,), no padding).
    key, kx = jax.random.split(key)
    x_small = jax.random.normal(kx, (8, num_inputs), jnp.float32)
    out_small = jax.block_until_ready(microneedle_quality_forward(x_small, params))
    assert out_small.shape == (8, num_outputs)
    assert jnp.allclose(out_small, reference_forward_bf16(x_small, params),
                        atol=1e-3, rtol=1e-3), "small batch: mismatch vs bf16 ref"
    assert jnp.allclose(out_small, reference_forward_f32(x_small, params),
                        atol=5e-2, rtol=5e-2), "small batch: mismatch vs f32 ref"

    # Case 2: non-multiple batch -> padding + 2 parallel tiles (streams the
    # batch grid and exercises the megacore split + row-slice path).
    key, kx2 = jax.random.split(key)
    x_big = jax.random.normal(kx2, (1037, num_inputs), jnp.float32)
    out_big = jax.block_until_ready(microneedle_quality_forward(x_big, params))
    assert out_big.shape == (1037, num_outputs)
    assert jnp.allclose(out_big, reference_forward_bf16(x_big, params),
                        atol=1e-3, rtol=1e-3), "big batch: mismatch vs bf16 ref"
    assert jnp.allclose(out_big, reference_forward_f32(x_big, params),
                        atol=5e-2, rtol=5e-2), "big batch: mismatch vs f32 ref"

    print("KERNEL_OK")
</pallas_src>

<mosaic_0001>
module attributes {stable_mosaic.version = 11 : i64} {
  func.func @_mlp_kernel(%arg0: i32, %arg1: memref<8x8xf32, #tpu.memory_space<vmem>>, %arg2: memref<8x128xbf16, #tpu.memory_space<vmem>>, %arg3: memref<1x128xf32, #tpu.memory_space<vmem>>, %arg4: memref<128x128xbf16, #tpu.memory_space<vmem>>, %arg5: memref<1x128xf32, #tpu.memory_space<vmem>>, %arg6: memref<128x64xbf16, #tpu.memory_space<vmem>>, %arg7: memref<1x64xf32, #tpu.memory_space<vmem>>, %arg8: memref<64x4xbf16, #tpu.memory_space<vmem>>, %arg9: memref<1x4xf32, #tpu.memory_space<vmem>>, %arg10: memref<8x4xf32, #tpu.memory_space<vmem>>) attributes {dimension_semantics = [#tpu.dimension_semantics<parallel>], iteration_bounds = array<i64: 1>, scalar_prefetch = 0 : i64, scratch_operands = 0 : i64, tpu.core_type = #tpu.core_type<tc>, window_params = [{transform_indices = @transform_0, window_bounds = array<i64: 8, 8>}, {pipeline_mode = #tpu.pipeline_mode<synchronous>, transform_indices = @transform_1, window_bounds = array<i64: 8, 128>}, {pipeline_mode = #tpu.pipeline_mode<synchronous>, transform_indices = @transform_2, window_bounds = array<i64: 1, 128>}, {pipeline_mode = #tpu.pipeline_mode<synchronous>, transform_indices = @transform_3, window_bounds = array<i64: 128, 128>}, {pipeline_mode = #tpu.pipeline_mode<synchronous>, transform_indices = @transform_4, window_bounds = array<i64: 1, 128>}, {pipeline_mode = #tpu.pipeline_mode<synchronous>, transform_indices = @transform_5, window_bounds = array<i64: 128, 64>}, {pipeline_mode = #tpu.pipeline_mode<synchronous>, transform_indices = @transform_6, window_bounds = array<i64: 1, 64>}, {pipeline_mode = #tpu.pipeline_mode<synchronous>, transform_indices = @transform_7, window_bounds = array<i64: 64, 4>}, {pipeline_mode = #tpu.pipeline_mode<synchronous>, transform_indices = @transform_8, window_bounds = array<i64: 1, 4>}, {transform_indices = @transform_9, window_bounds = array<i64: 8, 4>}]} {
    %c0 = arith.constant 0 : index
    %c0_0 = arith.constant 0 : index
    %0 = vector.load %arg1[%c0, %c0_0] : memref<8x8xf32, #tpu.memory_space<vmem>>, vector<8x8xf32>
    %1 = arith.truncf %0 : vector<8x8xf32> to vector<8x8xbf16>
    %c0_1 = arith.constant 0 : index
    %c0_2 = arith.constant 0 : index
    %2 = vector.load %arg2[%c0_1, %c0_2] : memref<8x128xbf16, #tpu.memory_space<vmem>>, vector<8x128xbf16>
    %cst = arith.constant dense<0.000000e+00> : vector<8x128xf32>
    %3 = tpu.matmul %1, %2, %cst {dimension_numbers = #tpu.dot_dimension_numbers<[1], [0], [0], [1], [0, 0, 1, 1], [], []>} : vector<8x8xbf16>, vector<8x128xbf16>, vector<8x128xf32> -> vector<8x128xf32>
    %c0_3 = arith.constant 0 : index
    %c0_4 = arith.constant 0 : index
    %4 = vector.load %arg3[%c0_3, %c0_4] : memref<1x128xf32, #tpu.memory_space<vmem>>, vector<1x128xf32>
    %5 = vector.broadcast %4 : vector<1x128xf32> to vector<8x128xf32>
    %6 = arith.addf %3, %5 : vector<8x128xf32>
    %cst_5 = arith.constant 0.000000e+00 : f32
    %7 = vector.broadcast %cst_5 : f32 to vector<8x128xf32>
    %8 = arith.maximumf %6, %7 : vector<8x128xf32>
    %9 = arith.truncf %8 : vector<8x128xf32> to vector<8x128xbf16>
    %c0_6 = arith.constant 0 : index
    %c0_7 = arith.constant 0 : index
    %10 = vector.load %arg4[%c0_6, %c0_7] : memref<128x128xbf16, #tpu.memory_space<vmem>>, vector<128x128xbf16>
    %cst_8 = arith.constant dense<0.000000e+00> : vector<8x128xf32>
    %11 = tpu.matmul %9, %10, %cst_8 {dimension_numbers = #tpu.dot_dimension_numbers<[1], [0], [0], [1], [0, 0, 1, 1], [], []>} : vector<8x128xbf16>, vector<128x128xbf16>, vector<8x128xf32> -> vector<8x128xf32>
    %c0_9 = arith.constant 0 : index
    %c0_10 = arith.constant 0 : index
    %12 = vector.load %arg5[%c0_9, %c0_10] : memref<1x128xf32, #tpu.memory_space<vmem>>, vector<1x128xf32>
    %13 = vector.broadcast %12 : vector<1x128xf32> to vector<8x128xf32>
    %14 = arith.addf %11, %13 : vector<8x128xf32>
    %cst_11 = arith.constant 0.000000e+00 : f32
    %15 = vector.broadcast %cst_11 : f32 to vector<8x128xf32>
    %16 = arith.maximumf %14, %15 : vector<8x128xf32>
    %17 = arith.truncf %16 : vector<8x128xf32> to vector<8x128xbf16>
    %c0_12 = arith.constant 0 : index
    %c0_13 = arith.constant 0 : index
    %18 = vector.load %arg6[%c0_12, %c0_13] : memref<128x64xbf16, #tpu.memory_space<vmem>>, vector<128x64xbf16>
    %cst_14 = arith.constant dense<0.000000e+00> : vector<8x64xf32>
    %19 = tpu.matmul %17, %18, %cst_14 {dimension_numbers = #tpu.dot_dimension_numbers<[1], [0], [0], [1], [0, 0, 1, 1], [], []>} : vector<8x128xbf16>, vector<128x64xbf16>, vector<8x64xf32> -> vector<8x64xf32>
    %c0_15 = arith.constant 0 : index
    %c0_16 = arith.constant 0 : index
    %20 = vector.load %arg7[%c0_15, %c0_16] : memref<1x64xf32, #tpu.memory_space<vmem>>, vector<1x64xf32>
    %21 = vector.broadcast %20 : vector<1x64xf32> to vector<8x64xf32>
    %22 = arith.addf %19, %21 : vector<8x64xf32>
    %cst_17 = arith.constant 0.000000e+00 : f32
    %23 = vector.broadcast %cst_17 : f32 to vector<8x64xf32>
    %24 = arith.maximumf %22, %23 : vector<8x64xf32>
    %25 = arith.truncf %24 : vector<8x64xf32> to vector<8x64xbf16>
    %c0_18 = arith.constant 0 : index
    %c0_19 = arith.constant 0 : index
    %26 = vector.load %arg8[%c0_18, %c0_19] : memref<64x4xbf16, #tpu.memory_space<vmem>>, vector<64x4xbf16>
    %cst_20 = arith.constant dense<0.000000e+00> : vector<8x4xf32>
    %27 = tpu.matmul %25, %26, %cst_20 {dimension_numbers = #tpu.dot_dimension_numbers<[1], [0], [0], [1], [0, 0, 1, 1], [], []>} : vector<8x64xbf16>, vector<64x4xbf16>, vector<8x4xf32> -> vector<8x4xf32>
    %c0_21 = arith.constant 0 : index
    %c0_22 = arith.constant 0 : index
    %28 = vector.load %arg9[%c0_21, %c0_22] : memref<1x4xf32, #tpu.memory_space<vmem>>, vector<1x4xf32>
    %29 = vector.broadcast %28 : vector<1x4xf32> to vector<8x4xf32>
    %30 = arith.addf %27, %29 : vector<8x4xf32>
    %c0_23 = arith.constant 0 : index
    %c0_24 = arith.constant 0 : index
    %31 = vector.load %arg10[%c0_23, %c0_24] : memref<8x4xf32, #tpu.memory_space<vmem>>, vector<8x4xf32>
    tpu.vector_store %arg10[%c0_23, %c0_24], %30 {strides = array<i32>} : memref<8x4xf32, #tpu.memory_space<vmem>>, vector<8x4xf32>,
    return
  }
  func.func @transform_0(%arg0: i32) -> (i32, i32) {
    %c0_i32 = arith.constant 0 : i32
    %c0_i32_0 = arith.constant 0 : i32
    return %arg0, %c0_i32 : i32, i32
  }
  func.func @transform_1(%arg0: i32) -> (i32, i32) {
    %c0_i32 = arith.constant 0 : i32
    %c0_i32_0 = arith.constant 0 : i32
    %c0_i32_1 = arith.constant 0 : i32
    return %c0_i32, %c0_i32_0 : i32, i32
  }
  func.func @transform_2(%arg0: i32) -> (i32, i32) {
    %c0_i32 = arith.constant 0 : i32
    %c0_i32_0 = arith.constant 0 : i32
    %c0_i32_1 = arith.constant 0 : i32
    return %c0_i32, %c0_i32_0 : i32, i32
  }
  func.func @transform_3(%arg0: i32) -> (i32, i32) {
    %c0_i32 = arith.constant 0 : i32
    %c0_i32_0 = arith.constant 0 : i32
    %c0_i32_1 = arith.constant 0 : i32
    return %c0_i32, %c0_i32_0 : i32, i32
  }
  func.func @transform_4(%arg0: i32) -> (i32, i32) {
    %c0_i32 = arith.constant 0 : i32
    %c0_i32_0 = arith.constant 0 : i32
    %c0_i32_1 = arith.constant 0 : i32
    return %c0_i32, %c0_i32_0 : i32, i32
  }
  func.func @transform_5(%arg0: i32) -> (i32, i32) {
    %c0_i32 = arith.constant 0 : i32
    %c0_i32_0 = arith.constant 0 : i32
    %c0_i32_1 = arith.constant 0 : i32
    return %c0_i32, %c0_i32_0 : i32, i32
  }
  func.func @transform_6(%arg0: i32) -> (i32, i32) {
    %c0_i32 = arith.constant 0 : i32
    %c0_i32_0 = arith.constant 0 : i32
    %c0_i32_1 = arith.constant 0 : i32
    return %c0_i32, %c0_i32_0 : i32, i32
  }
  func.func @transform_7(%arg0: i32) -> (i32, i32) {
    %c0_i32 = arith.constant 0 : i32
    %c0_i32_0 = arith.constant 0 : i32
    %c0_i32_1 = arith.constant 0 : i32
    return %c0_i32, %c0_i32_0 : i32, i32
  }
  func.func @transform_8(%arg0: i32) -> (i32, i32) {
    %c0_i32 = arith.constant 0 : i32
    %c0_i32_0 = arith.constant 0 : i32
    %c0_i32_1 = arith.constant 0 : i32
    return %c0_i32, %c0_i32_0 : i32, i32
  }
  func.func @transform_9(%arg0: i32) -> (i32, i32) {
    %c0_i32 = arith.constant 0 : i32
    %c0_i32_0 = arith.constant 0 : i32
    return %arg0, %c0_i32 : i32, i32
  }
}

</mosaic_0001>

<bundles_post_ra>
// kernel: microneedle_quality_forward.1
= control target key start
LH: loop header
LB: loop body
LE: loop exit
PB: predicated region body
PF: predicated region fallthrough
CT: control target
= control target key end

     0   :  { %vm47_vm0 = vcmask 1043456   ;;  %v539_v0 = vmov 0.0   ;;  %vm540_vm1 = vmmov 0   ;;  %vm43_vm2 = vcmask 64512   ;;  %s701_s1 = inlined_call_operand.vmem [shape: bf16[8,128], index: 1, kind: input, shape index: {}]   ;;  %s702_s0 = inlined_call_operand.vmem [shape: f32[8,8], index: 0, kind: input, shape index: {}]   ;;  %s703_s3 = inlined_call_operand.vmem [shape: bf16[128,128], index: 3, kind: input, shape index: {}]   ;;  %s704_s5 = inlined_call_operand.vmem [shape: bf16[128,64], index: 5, kind: input, shape index: {}]   ;;  %s705_s2 = inlined_call_operand.vmem [shape: f32[1,128], index: 2, kind: input, shape index: {}]   ;;  %s706_s7 = inlined_call_operand.vmem [shape: bf16[64,4], index: 7, kind: input, shape index: {}]   ;;  %s707_s4 = inlined_call_operand.vmem [shape: f32[1,128], index: 4, kind: input, shape index: {}]   ;;  %s708_s6 = inlined_call_operand.vmem [shape: f32[1,64], index: 6, kind: input, shape index: {}]   ;;  %s709_s8 = inlined_call_operand.vmem [shape: f32[1,4], index: 8, kind: input, shape index: {}]   ;;  %s710_s9 = inlined_call_operand.vmem [shape: f32[8,4], index: 9, kind: output, shape index: {}]  }
   0x1   :  { %459 = vmatprep.subr.bf16.mxu0 %v539_v0  ;;  %v35_v1 = vld [vmem:[%s701_s1] sm:$0xf]  ;;  %461 = vmatprep.mubr.msk.bf16.mxu0 %vm540_vm1, %v539_v0  ;;  %v519_v5 = vld [vmem:[%s703_s3 + $0x38] sm:$0xff]   ;;  %v520_v6 = vld [vmem:[%s703_s3 + $0x30] sm:$0xff]   ;;  %vm358_vm3 = vcmask 523264   ;;  %vm402_vm4 = vcmask 31744  }
   0x2   :  { %v33_v2 = vld [vmem:[%s702_s0] sm:$0xff]  ;;  %v49_v3 = vsel %vm47_vm0, %v35_v1, 0  ;;  %465 = vmatprep.subr.bf16.mxu1 %v539_v0  ;;  %481 = vmatprep.mubr.msk.bf16.mxu1 %vm540_vm1, %v539_v0  ;;  %v521_v7 = vld [vmem:[%s703_s3 + $0x28] sm:$0xff]   ;;  %v523_v9 = vld [vmem:[%s703_s3 + $0x18] sm:$0xff]  }
   0x3   :  { %v34_v4 = vpack.c.bf16 %v33_v2, %v33_v2  ;;  %460 = vmatpush3.bf16.msra.mxu0 %v49_v3  ;;  %466 = vmatpush3.bf16.msra.mxu1 %v519_v5  ;;  %v522_v8 = vld [vmem:[%s703_s3 + $0x20] sm:$0xff]   ;;  %v524_v10 = vld [vmem:[%s703_s3 + $0x10] sm:$0xff]   ;;  %v525_v11 = vld [vmem:[%s703_s3 + $0x8] sm:$0xff]  }
   0x4   :  { %485 = vmatprep.subr.bf16.mxu0 %v539_v0  ;;  %467 = vmatprep.subr.bf16.mxu1 %v539_v0  ;;  %v526_v12 = vld [vmem:[%s703_s3] sm:$0xff]   ;;  %v527_v13 = vld [vmem:[%s704_s5 + $0x38] sm:$0xff]   ;;  %v528_v14 = vld [vmem:[%s704_s5 + $0x30] sm:$0xff]  }
   0x5   :  { %v529_v15 = vld [vmem:[%s704_s5 + $0x28] sm:$0xff]   ;;  %v530_v16 = vld [vmem:[%s704_s5 + $0x20] sm:$0xff]   ;;  %v531_v17 = vld [vmem:[%s704_s5 + $0x18] sm:$0xff]  }
   0x6   :  { %462 = vmatmul.mubr.msk.bf16.vlgmr.msra.gmra.mxu0 %vm43_vm2, %v34_v4  ;;  %v532_v18 = vld [vmem:[%s704_s5 + $0x10] sm:$0xff]   ;;  %v408_v19 = vld [vmem:[%s705_s2] ss:$0 sm:$0xff]  ;;  %v533_v27 = vld [vmem:[%s704_s5 + $0x8] sm:$0xff]  }
   0x7   :  { %501 = vmatprep.mubr.msk.bf16.mxu0 %vm540_vm1, %v539_v0  ;;  %468 = vmatpush3.bf16.msra.mxu1 %v520_v6  ;;  %v534_v28 = vld [vmem:[%s704_s5] sm:$0xff]   ;;  %v535_v29 = vld [vmem:[%s706_s7 + $0x18] sm:$0xff]   ;;  %v536_v30 = vld [vmem:[%s706_s7 + $0x10] sm:$0xff]  }
   0x8   :  { %469 = vmatprep.subr.bf16.mxu1 %v539_v0  ;;  %486 = vmatpush3.bf16.msra.mxu0 %v527_v13  ;;  %v410_v31 = vld [vmem:[%s707_s4] ss:$0 sm:$0xff]  ;;  %v537_v39 = vld [vmem:[%s706_s7 + $0x8] sm:$0xff]  }
   0x9   :  { %487 = vmatprep.subr.bf16.mxu0 %v539_v0  ;;  %v538_v40 = vld [vmem:[%s706_s7] sm:$0xff]  }
   0xa   :  { %v419_v41 = vld [vmem:[%s708_s6] ss:$0 sm:$0xff] }
   0xb   :  { %470 = vmatpush3.bf16.msra.mxu1 %v521_v7  ;;  %v428_v49 = vld [vmem:[%s709_s8] ss:$0 sm:$0xff] }
   0xc   :  { %471 = vmatprep.subr.bf16.mxu1 %v539_v0  ;;  %488 = vmatpush3.bf16.msra.mxu0 %v528_v14 }
   0xd   :  { %489 = vmatprep.subr.bf16.mxu0 %v539_v0 }
   0xf   :  { %472 = vmatpush3.bf16.msra.mxu1 %v522_v8 }
  0x10   :  { %473 = vmatprep.subr.bf16.mxu1 %v539_v0  ;;  %490 = vmatpush3.bf16.msra.mxu0 %v529_v15 }
  0x11   :  { %491 = vmatprep.subr.bf16.mxu0 %v539_v0 }
  0x13   :  { %474 = vmatpush3.bf16.msra.mxu1 %v523_v9 }
  0x14   :  { %475 = vmatprep.subr.bf16.mxu1 %v539_v0  ;;  %492 = vmatpush3.bf16.msra.mxu0 %v530_v16 }
  0x15   :  { %493 = vmatprep.subr.bf16.mxu0 %v539_v0 }
  0x17   :  { %476 = vmatpush3.bf16.msra.mxu1 %v524_v10 }
  0x18   :  { %477 = vmatprep.subr.bf16.mxu1 %v539_v0  ;;  %494 = vmatpush3.bf16.msra.mxu0 %v531_v17 }
  0x19   :  { %495 = vmatprep.subr.bf16.mxu0 %v539_v0 }
  0x1b   :  { %478 = vmatpush3.bf16.msra.mxu1 %v525_v11 }
  0x1c   :  { %479 = vmatprep.subr.bf16.mxu1 %v539_v0  ;;  %496 = vmatpush3.bf16.msra.mxu0 %v532_v18 }
  0x1d   :  { %497 = vmatprep.subr.bf16.mxu0 %v539_v0 }
  0x1f   :  { %480 = vmatpush3.bf16.msra.mxu1 %v526_v12 }
  0x20   :  { %505 = vmatprep.subr.bf16.mxu1 %v539_v0  ;;  %498 = vmatpush3.bf16.msra.mxu0 %v533_v27 }
  0x21   :  { %499 = vmatprep.subr.bf16.mxu0 %v539_v0 }
  0x24   :  { %500 = vmatpush3.bf16.msra.mxu0 %v534_v28 }
  0xc6   :  { %v85_v20 = vpop.f32.mrf.mxu0 }
  0xc7   :  { %v86_v21 = vadd.f32 %v408_v19, %v85_v20 }
  0xc8   :  { %v463_v22 = vpop.f32.mrf.mxu0 }
  0xc9   :  { %v91_v23 = vmax.f32 %v86_v21, 0.0 }
  0xca   :  { %v88_v24 = vpop.f32.mrf.mxu0 }
  0xcb   :  { %v92_v25 = vpack.c.bf16 %v91_v23, %v91_v23 }
  0xcc   :  { %v464_v26 = vpop.f32.mrf.mxu0 }
  0xcd   :  { %482 = vmatmul.mubr.bf16.vlgmr.msra.gmra.mxu1 %v92_v25 }
  0xce   :  { %513 = vmatprep.mubr.msk.bf16.mxu1 %vm540_vm1, %v539_v0  ;;  %506 = vmatpush3.bf16.msra.mxu1 %v535_v29 }
  0xcf   :  { %507 = vmatprep.subr.bf16.mxu1 %v539_v0 }
  0xd2   :  { %508 = vmatpush3.bf16.msra.mxu1 %v536_v30 }
  0xd3   :  { %509 = vmatprep.subr.bf16.mxu1 %v539_v0 }
  0xd6   :  { %510 = vmatpush3.bf16.msra.mxu1 %v537_v39 }
  0xd7   :  { %511 = vmatprep.subr.bf16.mxu1 %v539_v0 }
  0xda   :  { %512 = vmatpush3.bf16.msra.mxu1 %v538_v40 }
 0x18d   :  { %v198_v32 = vpop.f32.mrf.mxu1 }
 0x18e   :  { %v199_v33 = vadd.f32 %v410_v31, %v198_v32 }
 0x18f   :  { %v483_v34 = vpop.f32.mrf.mxu1 }
 0x190   :  { %v204_v35 = vmax.f32 %v199_v33, 0.0 }
 0x191   :  { %v201_v36 = vpop.f32.mrf.mxu1 }
 0x192   :  { %v205_v37 = vpack.c.bf16 %v204_v35, %v204_v35 }
 0x193   :  { %v484_v38 = vpop.f32.mrf.mxu1 }
 0x194   :  { %502 = vmatmul.mubr.bf16.vlgmr.msra.gmra.mxu0 %v205_v37 }
 0x254   :  { %v311_v42 = vpop.f32.mrf.mxu0 }
 0x255   :  { %v312_v43 = vadd.f32 %v419_v41, %v311_v42 }
 0x256   :  { %v503_v44 = vpop.f32.mrf.mxu0 }
 0x257   :  { %v317_v45 = vmax.f32 %v312_v43, 0.0 }
 0x258   :  { %v314_v46 = vpop.f32.mrf.mxu0 }
 0x259   :  { %v318_v47 = vpack.c.bf16 %v317_v45, %v317_v45 }
 0x25a   :  { %v504_v48 = vpop.f32.mrf.mxu0 }
 0x25b   :  { %514 = vmatmul.mubr.msk.bf16.vlgmr.msra.gmra.mxu1 %vm358_vm3, %v318_v47 }
 0x31b   :  { %v396_v50 = vpop.f32.mrf.mxu1 }
 0x31c   :  { %v397_v51 = vadd.f32 %v428_v49, %v396_v50 }
 0x31d   :  { %v515_v52 = vpop.f32.mrf.mxu1 }
 0x31e   :  { %403 = vst.msk [vmem:[%s710_s9] sm:$0xff] %vm402_vm4, %v397_v51 }
 0x31f   :  { %v399_v53 = vpop.f32.mrf.mxu1 }
 0x321   :  { %v516_v54 = vpop.f32.mrf.mxu1 }

</bundles_post_ra>
